<compile_context>
chip_gen: v7x
topology: tpu7x:2x2x1
jax: 0.10.0
libtpu: 0.0.40
codegen_flags: <defaults>
</compile_context>

<pallas_src>
import functools

import jax
import jax.numpy as jnp
from jax import lax
from jax.experimental import pallas as pl
from jax.experimental.pallas import tpu as pltpu

EPS = 1e-5

# Host-side folding matmuls + the pure-JAX reference run in full f32 so the
# kernel can be checked against the reference at tight tolerance.
jax.config.update("jax_default_matmul_precision", "highest")


# ----------------------------------------------------------------------------
# Fused kernel: stem conv + BN + SiLU + streaming avg-pool + folded classifier
# ----------------------------------------------------------------------------
def _fused_kernel(x_ref, wconv_ref, bconv_ref, whead_ref, bhead_ref, o_ref,
                  acc_ref, *, inv_s):
    """One (batch, E-shard, spatial-tile) grid step.

    x_ref     : [C, tS]      input spatial tile (lane-dense spatial axis)
    wconv_ref : [E_blk, C]   BN-folded pointwise-conv weight (this E shard)
    bconv_ref : [E_blk, 1]   BN-folded conv bias
    whead_ref : [E_blk, Kp]  fully folded classifier head weight (lane padded)
    bhead_ref : [1, Kp]      folded head bias (pre-divided by e_par)
    o_ref     : [1, Kp]      (partial) logits for this (batch, E-shard)
    acc_ref   : [E_blk, 128] f32 streaming-pool accumulator (tile-size indep.)
    """
    s_idx = pl.program_id(2)
    n_s = pl.num_programs(2)

    @pl.when(s_idx == 0)
    def _init():
        acc_ref[...] = jnp.zeros_like(acc_ref)

    # Elementwise math kept in f32 (v5e has no bf16 VPU/EUP path).
    x = x_ref[...].astype(jnp.float32)                       # [C, tS]
    t_s = x.shape[1]

    # Pointwise 1x1 conv on the (otherwise idle) MXU:
    #   y[e, s] = sum_c w'[e, c] * x[c, s]      -> [E_blk(sublane), tS(lane)]
    y = jnp.dot(wconv_ref[...], x, preferred_element_type=jnp.float32)
    y = y + bconv_ref[...]                                   # BN folded into w'/b'
    # SiLU via a single EUP tanh push: sigmoid(y) = 0.5 * (1 + tanh(y/2)),
    # avoiding the exp + reciprocal/divide pair on the EUP/VPU.
    y = y * (0.5 * (1.0 + jnp.tanh(0.5 * y)))

    # Streaming global-average-pool: fold this tile's lanes down to 128 with
    # vreg-aligned VPU adds and accumulate into a tile-size-independent
    # [E_blk, 128] scratch (keeps VMEM pressure off the spatial tile size,
    # which matters inside v7x's 64 MiB / 32 MiB-scoped VMEM).
    n_full = t_s // 128
    rem = t_s - n_full * 128
    if n_full:
        part = y[:, 0:128]
        for i in range(1, n_full):
            part = part + y[:, i * 128:(i + 1) * 128]
        acc_ref[...] += part
    if rem:  # ragged tail tile (not hit when tS is a multiple of 128)
        acc_ref[:, :rem] += y[:, n_full * 128:]

    @pl.when(s_idx == n_s - 1)
    def _finalize():
        # Lane-reduce the pool accumulator on the MXU (ones-row @ acc^T) so the
        # embedding comes out as a lane-dense [1, E_blk] row with no transpose.
        ones_row = jnp.ones((1, 128), jnp.float32)
        emb = lax.dot_general(ones_row, acc_ref[...],
                              (((1,), (1,)), ((), ())),
                              preferred_element_type=jnp.float32) * inv_s
        # Folded head (BN1d + 3 linears; dropout = identity at inference) as a
        # single MXU dot.
        # TODO(synk): training-mode dropout masking (pltpu.prng_*) and the
        # un-collapsed head are not implemented here.
        logits = jnp.dot(emb, whead_ref[...],
                         preferred_element_type=jnp.float32)  # [1, Kp]
        o_ref[...] = (logits + bhead_ref[...]).astype(o_ref.dtype)


# ----------------------------------------------------------------------------
# Host-side helpers
# ----------------------------------------------------------------------------
def _pick_spatial_tile(S, C, E_blk, Kp, budget_bytes=16 * 1024 * 1024):
    """Largest spatial tile within a VMEM budget.

    Budget counts ~4x [E_blk, tS] f32 live temporaries (conv output + SiLU
    chain), the double-buffered input tile, the fixed [E_blk, 128] accumulator
    and the (double-buffered) constant weight blocks.  When the whole image
    fits, the spatial grid collapses to one step (no per-step overhead).
    """
    def fits(t):
        words = (4 * E_blk * t                      # y + SiLU temporaries
                 + 2 * C * t                        # double-buffered input tile
                 + E_blk * 128                      # pool accumulator scratch
                 + 2 * (E_blk * (C + 1 + Kp) + Kp))  # weights/biases (x2 buf)
        return 4 * words <= budget_bytes

    if fits(S):
        return S
    cands = [t for t in range(128, S, 128) if S % t == 0 and fits(t)]
    if cands:
        return max(cands)
    # TODO(synk): ragged / oversized S falls back to one full-width block
    # instead of masked partial tiles; may exceed the VMEM budget for huge S.
    return S


def _fold_params(params, num_categories, e_par):
    """Fold both BatchNorms and the activation-free head into kernel arrays."""
    E = params["stem_w"].shape[1]
    # Stem BN folded into the pointwise conv; weight stored [E, C] for the MXU.
    s_bn = params["bn_g"] * jax.lax.rsqrt(params["bn_var"] + EPS)        # [1, E]
    w_conv = (params["stem_w"] * s_bn).T                                 # [E, C]
    b_conv = ((params["stem_b"] - params["bn_mu"]) * s_bn
              + params["bn_b"]).reshape(E, 1)                            # [E, 1]

    # Head: BN1d + Linear*3 (no activations, dropout = identity) -> one affine.
    s_h = params["hbn_g"] * jax.lax.rsqrt(params["hbn_var"] + EPS)       # [1, E]
    w_chain = params["w1"] @ params["w2"] @ params["w3"]                 # [E, K]
    b_chain = (params["b1"] @ params["w2"] @ params["w3"]
               + params["b2"] @ params["w3"] + params["b3"])             # [1, K]
    w_head = s_h.reshape(E, 1) * w_chain                                 # [E, K]
    b_head = (params["hbn_b"] - params["hbn_mu"] * s_h) @ w_chain + b_chain

    K = num_categories
    Kp = max(128, ((K + 127) // 128) * 128)        # lane-dense (padded) logits
    w_head_p = jnp.zeros((E, Kp), jnp.float32).at[:, :K].set(w_head)
    # Each of the e_par partial products adds bias/e_par; summing the partials
    # outside the kernel reconstructs the full bias exactly once.
    b_head_p = jnp.zeros((1, Kp), jnp.float32).at[:, :K].set(b_head / e_par)
    return w_conv, b_conv, w_head_p, b_head_p, Kp


@jax.jit
def my_efficient_net_b_forward(x_nchw, params):
    """x_nchw: [B, C, H, W] -> logits [B, num_categories]."""
    B, C, H, W = x_nchw.shape
    S = H * W
    E = params["stem_w"].shape[1]
    K = params["w3"].shape[1]

    # v7x has 2 TensorCores; when B alone cannot feed both, split the E axis
    # into independent parallel shards whose partial logits are summed outside.
    e_par = 2 if (B < 2 and E % 16 == 0) else 1
    E_blk = E // e_par

    w_conv, b_conv, w_head_p, b_head_p, Kp = _fold_params(params, K, e_par)
    x3 = x_nchw.reshape(B, C, S)       # free reshape; spatial axis is lane-dense

    tS = _pick_spatial_tile(S, C, E_blk, Kp)
    n_s = S // tS
    grid = (B, e_par, n_s)

    kernel = functools.partial(_fused_kernel, inv_s=1.0 / float(S))

    out = pl.pallas_call(
        kernel,
        out_shape=jax.ShapeDtypeStruct((B, e_par, 1, Kp), jnp.float32),
        grid_spec=pltpu.PrefetchScalarGridSpec(
            num_scalar_prefetch=0,
            grid=grid,
            in_specs=[
                pl.BlockSpec((None, C, tS), lambda b, e, s: (b, 0, s)),   # x tile
                pl.BlockSpec((E_blk, C), lambda b, e, s: (e, 0)),         # w_conv
                pl.BlockSpec((E_blk, 1), lambda b, e, s: (e, 0)),         # b_conv
                pl.BlockSpec((E_blk, Kp), lambda b, e, s: (e, 0)),        # w_head
                pl.BlockSpec((1, Kp), lambda b, e, s: (0, 0)),            # b_head
            ],
            out_specs=pl.BlockSpec((None, None, 1, Kp),
                                   lambda b, e, s: (b, e, 0, 0)),
            scratch_shapes=[pltpu.VMEM((E_blk, 128), jnp.float32)],
        ),
        compiler_params=pltpu.CompilerParams(
            dimension_semantics=("parallel", "parallel", "arbitrary"),
            vmem_limit_bytes=32 * 1024 * 1024,
        ),
    )(x3, w_conv, b_conv, w_head_p, b_head_p)

    # Sum the E-shard partial logits (no-op when e_par == 1) and drop padding.
    return out.sum(axis=1)[:, 0, :K]


# ----------------------------------------------------------------------------
# Pure-JAX reference (original unfolded math) for a sanity check.
# ----------------------------------------------------------------------------
def _reference(x_nchw, p):
    B, C, H, W = x_nchw.shape
    x = jnp.transpose(x_nchw, (0, 2, 3, 1)).reshape(B, H * W, C)
    y = jnp.einsum("bsc,ce->bse", x, p["stem_w"]) + p["stem_b"]
    y = (y - p["bn_mu"]) * (p["bn_g"] / jnp.sqrt(p["bn_var"] + EPS)) + p["bn_b"]
    y = y * jax.nn.sigmoid(y)
    e = jnp.mean(y, axis=1)
    e = (e - p["hbn_mu"]) * (p["hbn_g"] / jnp.sqrt(p["hbn_var"] + EPS)) + p["hbn_b"]
    h1 = e @ p["w1"] + p["b1"]
    h2 = h1 @ p["w2"] + p["b2"]
    return h2 @ p["w3"] + p["b3"]


def init_params(key, in_channels, embedding_size, num_categories):
    E = embedding_size
    ks = jax.random.split(key, 12)
    scale = 0.1
    p = {
        # Synthetic backbone stem (pointwise conv + BN).
        "stem_w": scale * jax.random.normal(ks[0], (in_channels, E), jnp.float32),
        "stem_b": scale * jax.random.normal(ks[1], (1, E), jnp.float32),
        "bn_g": 1.0 + scale * jax.random.normal(ks[2], (1, E), jnp.float32),
        "bn_b": scale * jax.random.normal(ks[3], (1, E), jnp.float32),
        "bn_mu": scale * jax.random.normal(ks[4], (1, E), jnp.float32),
        "bn_var": 1.0 + 0.05 * jax.random.uniform(ks[5], (1, E), jnp.float32),
        # my_classifier: BatchNorm1d(E) + 3 Linears (weights stored [in, out]).
        "hbn_g": 1.0 + scale * jax.random.normal(ks[6], (1, E), jnp.float32),
        "hbn_b": scale * jax.random.normal(ks[7], (1, E), jnp.float32),
        "hbn_mu": scale * jax.random.normal(ks[8], (1, E), jnp.float32),
        "hbn_var": 1.0 + 0.05 * jax.random.uniform(ks[9], (1, E), jnp.float32),
        "w1": scale * jax.random.normal(ks[10], (E, E // 2), jnp.float32),
        "b1": jnp.zeros((1, E // 2), jnp.float32),
        "w2": scale * jax.random.normal(ks[11], (E // 2, E // 4), jnp.float32),
        "b2": jnp.zeros((1, E // 4), jnp.float32),
        "w3": scale * jax.random.normal(jax.random.fold_in(key, 99),
                                        (E // 4, num_categories), jnp.float32),
        "b3": jnp.zeros((1, num_categories), jnp.float32),
    }
    return p


if __name__ == "__main__":
    key = jax.random.PRNGKey(0)
    k_x, k_p = jax.random.split(key)

    B, C, H, W = 2, 4, 16, 16          # small NCHW input, as in torch
    embedding_size = 32                # backbone.classifier[1].in_features
    num_categories = 10

    x = jax.random.normal(k_x, (B, C, H, W), jnp.float32)
    params = init_params(k_p, C, embedding_size, num_categories)

    out = my_efficient_net_b_forward(x, params)
    out = jax.block_until_ready(out)

    ref = _reference(x, params)
    assert out.shape == (B, num_categories), out.shape
    # Tolerance allows for the MXU f32 path (multi-pass bf16 emulation depending
    # on precision settings); in practice the error is far smaller.
    assert jnp.allclose(out, ref, atol=1e-3, rtol=1e-3), (
        f"max abs diff {jnp.max(jnp.abs(out - ref))}")

    print("KERNEL_OK")
</pallas_src>

<mosaic_0001>
module attributes {stable_mosaic.version = 11 : i64} {
  func.func @_fused_kernel(%arg0: i32, %arg1: i32, %arg2: i32, %arg3: memref<1x4x256xf32, #tpu.memory_space<vmem>>, %arg4: memref<32x4xf32, #tpu.memory_space<vmem>>, %arg5: memref<32x1xf32, #tpu.memory_space<vmem>>, %arg6: memref<32x128xf32, #tpu.memory_space<vmem>>, %arg7: memref<1x128xf32, #tpu.memory_space<vmem>>, %arg8: memref<1x1x1x128xf32, #tpu.memory_space<vmem>>, %arg9: memref<32x128xf32, #tpu.memory_space<vmem>>) attributes {dimension_semantics = [#tpu.dimension_semantics<parallel>, #tpu.dimension_semantics<parallel>, #tpu.dimension_semantics<arbitrary>], iteration_bounds = array<i64: 2, 1, 1>, scalar_prefetch = 0 : i64, scratch_operands = 1 : i64, tpu.core_type = #tpu.core_type<tc>, window_params = [{transform_indices = @transform_0, window_bounds = array<i64: 1, 4, 256>}, {transform_indices = @transform_1, window_bounds = array<i64: 32, 4>}, {transform_indices = @transform_2, window_bounds = array<i64: 32, 1>}, {transform_indices = @transform_3, window_bounds = array<i64: 32, 128>}, {pipeline_mode = #tpu.pipeline_mode<synchronous>, transform_indices = @transform_4, window_bounds = array<i64: 1, 128>}, {transform_indices = @transform_5, window_bounds = array<i64: 1, 1, 1, 128>}]} {
    %c0_i32 = arith.constant 0 : i32
    %0 = arith.cmpi eq, %arg2, %c0_i32 : i32
    %1 = arith.extui %0 : i1 to i32
    %c0_i32_0 = arith.constant 0 : i32
    %2 = arith.cmpi ne, %1, %c0_i32_0 : i32
    scf.if %2 {
      %cst_16 = arith.constant 0.000000e+00 : f32
      %27 = vector.broadcast %cst_16 : f32 to vector<32x128xf32>
      %c0_17 = arith.constant 0 : index
      %c0_18 = arith.constant 0 : index
      %28 = vector.load %arg9[%c0_17, %c0_18] : memref<32x128xf32, #tpu.memory_space<vmem>>, vector<32x128xf32>
      tpu.vector_store %arg9[%c0_17, %c0_18], %27 {strides = array<i32>} : memref<32x128xf32, #tpu.memory_space<vmem>>, vector<32x128xf32>,
    } else {
    }
    %c0 = arith.constant 0 : index
    %c0_1 = arith.constant 0 : index
    %c0_2 = arith.constant 0 : index
    %3 = vector.load %arg3[%c0, %c0_1, %c0_2] : memref<1x4x256xf32, #tpu.memory_space<vmem>>, vector<1x4x256xf32>
    %4 = vector.shape_cast %3 : vector<1x4x256xf32> to vector<4x256xf32>
    %c0_3 = arith.constant 0 : index
    %c0_4 = arith.constant 0 : index
    %5 = vector.load %arg4[%c0_3, %c0_4] : memref<32x4xf32, #tpu.memory_space<vmem>>, vector<32x4xf32>
    %cst = arith.constant dense<0.000000e+00> : vector<32x256xf32>
    %6 = tpu.matmul %5, %4, %cst {dimension_numbers = #tpu.dot_dimension_numbers<[1], [0], [0], [1], [0, 0, 1, 1], [], []>, precision = #tpu.contract_precision<fp32>} : vector<32x4xf32>, vector<4x256xf32>, vector<32x256xf32> -> vector<32x256xf32>
    %c0_5 = arith.constant 0 : index
    %c0_6 = arith.constant 0 : index
    %7 = vector.load %arg5[%c0_5, %c0_6] : memref<32x1xf32, #tpu.memory_space<vmem>>, vector<32x1xf32>
    %8 = vector.broadcast %7 : vector<32x1xf32> to vector<32x256xf32>
    %9 = arith.addf %6, %8 : vector<32x256xf32>
    %cst_7 = arith.constant 5.000000e-01 : f32
    %10 = vector.broadcast %cst_7 : f32 to vector<32x256xf32>
    %11 = arith.mulf %10, %9 : vector<32x256xf32>
    %12 = math.tanh %11 : vector<32x256xf32>
    %cst_8 = arith.constant 1.000000e+00 : f32
    %13 = vector.broadcast %cst_8 : f32 to vector<32x256xf32>
    %14 = arith.addf %13, %12 : vector<32x256xf32>
    %cst_9 = arith.constant 5.000000e-01 : f32
    %15 = vector.broadcast %cst_9 : f32 to vector<32x256xf32>
    %16 = arith.mulf %15, %14 : vector<32x256xf32>
    %17 = arith.mulf %9, %16 : vector<32x256xf32>
    %18 = vector.extract_strided_slice %17 {offsets = [0, 0], sizes = [32, 128], strides = [1, 1]} : vector<32x256xf32> to vector<32x128xf32>
    %19 = vector.extract_strided_slice %17 {offsets = [0, 128], sizes = [32, 128], strides = [1, 1]} : vector<32x256xf32> to vector<32x128xf32>
    %20 = arith.addf %18, %19 : vector<32x128xf32>
    %c0_10 = arith.constant 0 : index
    %c0_11 = arith.constant 0 : index
    %21 = vector.load %arg9[%c0_10, %c0_11] : memref<32x128xf32, #tpu.memory_space<vmem>>, vector<32x128xf32>
    %22 = arith.addf %21, %20 : vector<32x128xf32>
    %c0_12 = arith.constant 0 : index
    %c0_13 = arith.constant 0 : index
    %23 = vector.load %arg9[%c0_12, %c0_13] : memref<32x128xf32, #tpu.memory_space<vmem>>, vector<32x128xf32>
    tpu.vector_store %arg9[%c0_12, %c0_13], %22 {strides = array<i32>} : memref<32x128xf32, #tpu.memory_space<vmem>>, vector<32x128xf32>,
    %c0_i32_14 = arith.constant 0 : i32
    %24 = arith.cmpi eq, %arg2, %c0_i32_14 : i32
    %25 = arith.extui %24 : i1 to i32
    %c0_i32_15 = arith.constant 0 : i32
    %26 = arith.cmpi ne, %25, %c0_i32_15 : i32
    scf.if %26 {
      %cst_16 = arith.constant 1.000000e+00 : f32
      %27 = vector.broadcast %cst_16 : f32 to vector<1x128xf32>
      %c0_17 = arith.constant 0 : index
      %c0_18 = arith.constant 0 : index
      %28 = vector.load %arg9[%c0_17, %c0_18] : memref<32x128xf32, #tpu.memory_space<vmem>>, vector<32x128xf32>
      %cst_19 = arith.constant dense<0.000000e+00> : vector<1x32xf32>
      %29 = tpu.matmul %27, %28, %cst_19 {dimension_numbers = #tpu.dot_dimension_numbers<[1], [1], [0], [0], [0, 0, 1, 0], [], []>, precision = #tpu.contract_precision<fp32>} : vector<1x128xf32>, vector<32x128xf32>, vector<1x32xf32> -> vector<1x32xf32>
      %cst_20 = arith.constant 3.906250e-03 : f32
      %30 = vector.broadcast %cst_20 : f32 to vector<1x32xf32>
      %31 = arith.mulf %29, %30 : vector<1x32xf32>
      %c0_21 = arith.constant 0 : index
      %c0_22 = arith.constant 0 : index
      %32 = vector.load %arg6[%c0_21, %c0_22] : memref<32x128xf32, #tpu.memory_space<vmem>>, vector<32x128xf32>
      %cst_23 = arith.constant dense<0.000000e+00> : vector<1x128xf32>
      %33 = tpu.matmul %31, %32, %cst_23 {dimension_numbers = #tpu.dot_dimension_numbers<[1], [0], [0], [1], [0, 0, 1, 1], [], []>, precision = #tpu.contract_precision<fp32>} : vector<1x32xf32>, vector<32x128xf32>, vector<1x128xf32> -> vector<1x128xf32>
      %c0_24 = arith.constant 0 : index
      %c0_25 = arith.constant 0 : index
      %34 = vector.load %arg7[%c0_24, %c0_25] : memref<1x128xf32, #tpu.memory_space<vmem>>, vector<1x128xf32>
      %35 = arith.addf %33, %34 : vector<1x128xf32>
      %c0_26 = arith.constant 0 : index
      %c0_27 = arith.constant 0 : index
      %c0_28 = arith.constant 0 : index
      %c0_29 = arith.constant 0 : index
      %36 = vector.load %arg8[%c0_26, %c0_27, %c0_28, %c0_29] : memref<1x1x1x128xf32, #tpu.memory_space<vmem>>, vector<1x1x1x128xf32>
      %37 = vector.shape_cast %36 : vector<1x1x1x128xf32> to vector<1x128xf32>
      %38 = vector.shape_cast %35 : vector<1x128xf32> to vector<1x1x1x128xf32>
      tpu.vector_store %arg8[%c0_26, %c0_27, %c0_28, %c0_29], %38 {strides = array<i32>} : memref<1x1x1x128xf32, #tpu.memory_space<vmem>>, vector<1x1x1x128xf32>,
    } else {
    }
    return
  }
  func.func @transform_0(%arg0: i32, %arg1: i32, %arg2: i32) -> (i32, i32, i32) {
    %c0_i32 = arith.constant 0 : i32
    %c0_i32_0 = arith.constant 0 : i32
    return %arg0, %c0_i32, %arg2 : i32, i32, i32
  }
  func.func @transform_1(%arg0: i32, %arg1: i32, %arg2: i32) -> (i32, i32) {
    %c0_i32 = arith.constant 0 : i32
    %c0_i32_0 = arith.constant 0 : i32
    return %arg1, %c0_i32 : i32, i32
  }
  func.func @transform_2(%arg0: i32, %arg1: i32, %arg2: i32) -> (i32, i32) {
    %c0_i32 = arith.constant 0 : i32
    %c0_i32_0 = arith.constant 0 : i32
    return %arg1, %c0_i32 : i32, i32
  }
  func.func @transform_3(%arg0: i32, %arg1: i32, %arg2: i32) -> (i32, i32) {
    %c0_i32 = arith.constant 0 : i32
    %c0_i32_0 = arith.constant 0 : i32
    return %arg1, %c0_i32 : i32, i32
  }
  func.func @transform_4(%arg0: i32, %arg1: i32, %arg2: i32) -> (i32, i32) {
    %c0_i32 = arith.constant 0 : i32
    %c0_i32_0 = arith.constant 0 : i32
    %c0_i32_1 = arith.constant 0 : i32
    return %c0_i32, %c0_i32_0 : i32, i32
  }
  func.func @transform_5(%arg0: i32, %arg1: i32, %arg2: i32) -> (i32, i32, i32, i32) {
    %c0_i32 = arith.constant 0 : i32
    %c0_i32_0 = arith.constant 0 : i32
    %c0_i32_1 = arith.constant 0 : i32
    return %arg0, %arg1, %c0_i32, %c0_i32_0 : i32, i32, i32, i32
  }
}

</mosaic_0001>

<bundles_post_ra>
// kernel: my_efficient_net_b_forward.1
= control target key start
LH: loop header
LB: loop body
LE: loop exit
PB: predicated region body
PF: predicated region fallthrough
CT: control target
= control target key end

     0   :  { %s2605_s18 = smov 0   ;;  %s2607_s19 = smov 0   ;;  %s2824_s0 = inlined_call_operand.vmem [shape: f32[2,4,256], index: 0, kind: input, shape index: {}]   ;;  %s2825_s1 = inlined_call_operand.vmem [shape: f32[32,4], index: 1, kind: input, shape index: {}]   ;;  %s2826_s2 = inlined_call_operand.vmem [shape: f32[32,1], index: 2, kind: input, shape index: {}]   ;;  %s2827_s3 = inlined_call_operand.vmem [shape: f32[32,128], index: 3, kind: input, shape index: {}]   ;;  %s2828_s4 = inlined_call_operand.vmem [shape: f32[1,128], index: 4, kind: input, shape index: {}]   ;;  %s2829_s5 = inlined_call_operand.vmem [shape: f32[2,1,1,128], index: 5, kind: output, shape index: {}]  }
   0x1   :  { %s2609_s20 = smov 0  }
   0x2 LB: > { %s34_s21 = sadd.s32 1, %s2564_s19  ;;  %p2157_p0 = scmp.ge.s32.totalorder %s2568_s20, 1  ;;  %s2568_s20 = sphi %s2609_s20, %s15_s20   ;;  %s2564_s19 = sphi %s2607_s19, %s2831_s19   ;;  %s2560_s18 = sphi %s2605_s18, %s2830_s18  }
   0x3   : > { %p36_p1 = scmp.ge.s32.totalorder %s34_s21, 2  ;;  %p248_p2 = scmp.lt.s32.totalorder %s2568_s20, 3 }
   0x5   : > { %s2833_s21 = smov (%p36_p1, %s34_s21), 0  ;;  %p249_p3 = pnand %p2157_p0, %p248_p2 }
   0x6   : > { %p297_p4 = scmp.lt.s32.totalorder (!%p249_p3), %s2560_s18, 1  ;;  %v339_v0 = vld [vmem:[%s2825_s1] sm:$0xff] (!%p249_p3)  ;;  %vm369_vm0 = vcmask (!%p249_p3), 31744   ;;  %v340_v1 = vld [vmem:[%s2825_s1 + $0x8] sm:$0xff] (!%p249_p3)  ;;  %v2570_v2 = vmov (!%p249_p3), 0.0   ;;  %v341_v5 = vld [vmem:[%s2825_s1 + $0x10] sm:$0xff] (!%p249_p3) }
   0x7   : > { %252 = sbr.rel (%p249_p3) target bundleno = 896 (0x380), region = 40  ;;  %453 = vmatprep.mubr.f32.mxu0 (!%p249_p3), %v2570_v2  ;;  %464 = vmatprep.mubr.f32.mxu1 (!%p249_p3), %v2570_v2  ;;  %v371_v3 = vsel (!%p249_p3), %vm369_vm0, %v339_v0, 0  ;;  %v374_v4 = vsel (!%p249_p3), %vm369_vm0, %v340_v1, 0  ;;  %v342_v6 = vld [vmem:[%s2825_s1 + $0x18] sm:$0xff] (!%p249_p3)  ;;  %v343_v7 = vld [vmem:[%s2826_s2] sm:$0xff] (!%p249_p3)  ;;  %v377_v10 = vsel (!%p249_p3), %vm369_vm0, %v341_v5, 0 }
   0x8   : > { %v2642_v8 = vand.u32 (!%p249_p3), 4294901760, %v371_v3  ;;  %v2644_v9 = vand.u32 (!%p249_p3), 4294901760, %v374_v4  ;;  %v380_v11 = vsel (!%p249_p3), %vm369_vm0, %v342_v6, 0  ;;  %v2571_v12 = vmov (!%p249_p3), 0   ;;  %v345_v15 = vld [vmem:[%s2826_s2 + $0x10] sm:$0xff] (!%p249_p3)  ;;  %v344_v18 = vld [vmem:[%s2826_s2 + $0x8] sm:$0xff] (!%p249_p3) }
   0x9   : > { %2527 = vset.pattern.permute.xlu0 (!%p249_p3), %v2571_v12  ;;  %2528 = vset.pattern.permute.xlu1 (!%p249_p3), %v2571_v12  ;;  %v2646_v13 = vand.u32 (!%p249_p3), 4294901760, %v377_v10  ;;  %v2648_v14 = vand.u32 (!%p249_p3), 4294901760, %v380_v11  ;;  %vm382_vm1 = vcmask (!%p249_p3), 1043456   ;;  %v346_v21 = vld [vmem:[%s2826_s2 + $0x18] sm:$0xff] (!%p249_p3)  ;;  %v2572_v48 = vmov (!%p249_p3), 0.0|0.0  }
   0xa   : > { %349 = vperm.xlu0 (!%p249_p3), %2527, %v343_v7   ;;  %v2655_v16 = vsub.f32 (!%p249_p3), %v371_v3, %v2642_v8  ;;  %v2658_v17 = vsub.f32 (!%p249_p3), %v374_v4, %v2644_v9  ;;  %359 = vperm.xlu1 (!%p249_p3), %2528, %v345_v15   ;;  %vm2573_vm2 = vmmov (!%p249_p3), 0   ;;  %v1535_v3 = vld [vmem:[%s2827_s3] sm:$0xff] (!%p249_p3)  ;;  %v1536_v4 = vld [vmem:[%s2827_s3 + $0x8] sm:$0xff] (!%p249_p3)  ;;  %vm1540_vm3 = vcmask (!%p249_p3), 261120  }
   0xb   : > { %v2667_v19 = vsub.f32 (!%p249_p3), %v377_v10, %v2646_v13  ;;  %v2670_v20 = vsub.f32 (!%p249_p3), %v380_v11, %v2648_v14  ;;  %v1545_v7 = vand.u32 (!%p249_p3), 4294901760, %v1535_v3 }
   0xc   : > { %v456_v23 = vand.u32 (!%p249_p3), 4294901760, %v2655_v16  ;;  %v467_v24 = vand.u32 (!%p249_p3), 4294901760, %v2658_v17 }
   0xd   : > { %v478_v27 = vand.u32 (!%p249_p3), 4294901760, %v2667_v19  ;;  %v489_v33 = vand.u32 (!%p249_p3), 4294901760, %v2670_v20 }
   0xe   : > { %s2835_s18 = smov (!%p297_p4, %s2560_s18), 1  ;;  %354 = vperm.xlu0 %2527, %v344_v18   ;;  %v457_v29 = vsub.f32 %v2655_v16, %v456_v23  ;;  %v468_v30 = vsub.f32 %v2658_v17, %v467_v24  ;;  %364 = vperm.xlu1 %2528, %v346_v21  }
   0xf   : > { %s2162_s9 = sshll.u32 %s2835_s18, 3  ;;  %v479_v32 = vsub.f32 %v2667_v19, %v478_v27  ;;  %v490_v41 = vsub.f32 %v2670_v20, %v489_v33  ;;  %s329_s8 = scalar_lea.vmem %s2829_s5, %s2835_s18 }
  0x10   : > { %s304_s14 = scalar_lea.vmem %s2824_s0, %s2162_s9  ;;  %v458_v35 = vand.u32 4294901760, %v457_v29  ;;  %v469_v36 = vand.u32 4294901760, %v468_v30 }
  0x11   : > { %v338_v22 = vld [vmem:[%s304_s14] sm:$0xff]  ;;  %v480_v40 = vand.u32 4294901760, %v479_v32  ;;  %v491_v46 = vand.u32 4294901760, %v490_v41 }
  0x12   : > { %v368_v25 = vcombine.high %v338_v22, %v338_v22  ;;  %v383_v26 = vsel %vm382_vm1, %v338_v22, 0 }
  0x13   : > { %v2679_v28 = vand.u32 4294901760, %v383_v26 }
  0x14   : > { %v385_v31 = vsel %vm382_vm1, %v368_v25, 0 }
  0x15   : > { %v387_v34 = vand.u32 4294901760, %v385_v31  ;;  %v505_v37 = vsub.f32 %v383_v26, %v2679_v28 }
  0x17   : > { %388 = vmatprep.subr.mxu0 %v387_v34  ;;  %2427 = vmatprep.subr.mxu1 %v387_v34  ;;  %v499_v38 = vsub.f32 %v385_v31, %v387_v34  ;;  %v506_v39 = vand.u32 4294901760, %v505_v37 }
  0x18   : > { %390 = vmatpush1.msra.mxu0 %v2679_v28  ;;  %2428 = vmatpush1.msra.mxu1 %v2679_v28 }
  0x19   : > { %459 = vmatmul.mubr.f32.vlgmr.msra.gmra.mrb[0].mxu0 %v458_v35  ;;  %470 = vmatmul.mubr.f32.vlgmr.msra.gmra.mrb[0].mxu1 %v469_v36  ;;  %v500_v42 = vand.u32 4294901760, %v499_v38  ;;  %v507_v43 = vsub.f32 %v505_v37, %v506_v39 }
  0x1a   : > { %603 = vmatprep.subr.mxu0 %v499_v38  ;;  %475 = vmatprep.mubr.f32.mxu1 %v2570_v2 }
  0x1b   : > { %606 = vmatpush1.msra.mxu0 %v505_v37  ;;  %669 = vmatprep.mubr.f32.mxu0 %v2570_v2  ;;  %v501_v44 = vsub.f32 %v499_v38, %v500_v42  ;;  %v508_v45 = vand.u32 4294901760, %v507_v43 }
  0x1c   : > { %703 = vmatprep.subr.mxu0 %v387_v34 }
  0x1d   : > { %481 = vmatmul.mubr.f32.gmra.mrb[2].mxu1 %v480_v40  ;;  %672 = vmatmul.mubr.f32.vlgmr.msra.gmra.mrb[2].mxu0 %v2655_v16  ;;  %v502_v47 = vand.u32 4294901760, %v501_v44 }
  0x1e   : > { %705 = vmatpush1.msra.mxu0 %v2679_v28  ;;  %486 = vmatprep.mubr.f32.mxu1 %v2570_v2 }
  0x1f   : > { %677 = vmatprep.mubr.f32.mxu0 %v2570_v2  ;;  %503 = vmatprep.subr.mxu1 %v502_v47 }
  0x20   : > { %509 = vmatpush1.msra.mxu1 %v508_v45  ;;  %808 = vmatprep.subr.mxu0 %v500_v42 }
  0x21   : > { %492 = vmatmul.mubr.f32.gmra.mrb[4].mxu1 %v491_v46  ;;  %680 = vmatmul.mubr.f32.gmra.mrb[4].mxu0 %v2658_v17 }
  0x22   : > { %572 = vmatprep.mubr.f32.mxu1 %v2570_v2  ;;  %685 = vmatprep.mubr.f32.mxu0 %v2570_v2 }
  0x23   : > { %2355 = vmatprep.subr.bf16.mxu1 %v2572_v48 }
  0x25   : > { %574 = vmatmul.mubr.f32.vlgmr.msra.gmra.mrb[6].mxu1 %v2642_v8  ;;  %688 = vmatmul.mubr.f32.gmra.mrb[6].mxu0 %v2667_v19 }
  0x26   : > { %693 = vmatprep.mubr.f32.mxu0 %v2570_v2  ;;  %579 = vmatprep.mubr.f32.mxu1 %v2570_v2 }
  0x29   : > { %696 = vmatmul.mubr.f32.gmra.mrb[8].mxu0 %v2670_v20  ;;  %581 = vmatmul.mubr.f32.gmra.mrb[0].mxu1 %v2644_v9 }
  0x2a   : > { %768 = vmatprep.mubr.f32.mxu0 %v2570_v2  ;;  %586 = vmatprep.mubr.f32.mxu1 %v2570_v2 }
  0x2d   : > { %772 = vmatmul.mubr.f32.vlgmr.msra.gmra.mrb[2].mxu0 %v456_v23  ;;  %588 = vmatmul.mubr.f32.gmra.mrb[2].mxu1 %v2646_v13 }
  0x2e   : > { %812 = vmatpush1.msra.mxu0 %v506_v39  ;;  %777 = vmatprep.mubr.f32.mxu0 %v2570_v2 }
  0x2f   : > { %905 = vmatprep.subr.mxu0 %v387_v34  ;;  %593 = vmatprep.mubr.f32.mxu1 %v2570_v2 }
  0x31   : > { %781 = vmatmul.mubr.f32.gmra.mrb[4].mxu0 %v467_v24  ;;  %595 = vmatmul.mubr.f32.gmra.mrb[4].mxu1 %v2648_v14 }
  0x32   : > { %786 = vmatprep.mubr.f32.mxu0 %v2570_v2  ;;  %2231 = vmatprep.mubr.msk.f32.mxu1 %vm2573_vm2, %v2570_v2 }
  0x35   : > { %790 = vmatmul.mubr.f32.gmra.mrb[6].mxu0 %v478_v27 }
  0x36   : > { %795 = vmatprep.mubr.f32.mxu0 %v2570_v2 }
  0x39   : > { %799 = vmatmul.mubr.f32.gmra.mrb[8].mxu0 %v489_v33 }
  0x3a   : > { %875 = vmatprep.mubr.f32.mxu0 %v2570_v2 }
  0x3d   : > { %877 = vmatmul.mubr.f32.vlgmr.msra.gmra.mrb[2].mxu0 %v2642_v8 }
  0x3e   : > { %907 = vmatpush1.msra.mxu0 %v2679_v28  ;;  %882 = vmatprep.mubr.f32.mxu0 %v2570_v2 }
  0x3f   : > { %2391 = vmatprep.subr.bf16.mxu0 %v2572_v48 }
  0x41   : > { %884 = vmatmul.mubr.f32.gmra.mrb[4].mxu0 %v2644_v9 }
  0x42   : > { %889 = vmatprep.mubr.f32.mxu0 %v2570_v2 }
  0x45   : > { %891 = vmatmul.mubr.f32.gmra.mrb[6].mxu0 %v2646_v13 }
  0x46   : > { %896 = vmatprep.mubr.f32.mxu0 %v2570_v2 }
  0x49   : > { %898 = vmatmul.mubr.f32.gmra.mrb[8].mxu0 %v2648_v14 }
  0x4a   : > { %970 = vmatprep.mubr.f32.mxu0 %v2570_v2 }
  0x4d   : > { %972 = vmatmul.mubr.f32.vlgmr.msra.gmra.mrb[2].mxu0 %v2642_v8  ;;  %v1548_v8 = vand.u32 4294901760, %v1536_v4 }
  0x4e   : > { %977 = vmatprep.mubr.f32.mxu0 %v2570_v2 }
  0x4f   : > { %v2746_v15 = vsub.f32 %v1536_v4, %v1548_v8 }
  0x51   : > { %979 = vmatmul.mubr.f32.gmra.mrb[4].mxu0 %v2644_v9 }
  0x52   : > { %984 = vmatprep.mubr.f32.mxu0 %v2570_v2 }
  0x55   : > { %986 = vmatmul.mubr.f32.gmra.mrb[6].mxu0 %v2646_v13  ;;  %v2742_v13 = vpack.c.bf16 %v1548_v8, %v1545_v7 }
  0x56   : > { %991 = vmatprep.mubr.f32.mxu0 %v2570_v2 }
  0x57   : > { %2393 = vmatpush3.bf16.msra.mxu0 %v2742_v13 }
  0x58   : > { %2394 = vmatprep.subr.bf16.mxu0 %v2572_v48 }
  0x59   : > { %993 = vmatmul.mubr.f32.gmra.mrb[8].mxu0 %v2648_v14  ;;  %v2744_v14 = vsub.f32 %v1535_v3, %v1545_v7 }
  0x5a   : > { %2297 = vmatprep.mubr.msk.f32.mxu0 %vm2573_vm2, %v2570_v2 }
  0x89   : > { %v350_v51 = vpop.permute.xlu0 %349  ;;  %v360_v10 = vpop.permute.xlu1 %359 }
  0x8d   : > { %v355_v0 = vpop.permute.xlu0 %354  ;;  %v365_v25 = vpop.permute.xlu1 %364 }
  0xec   : > { %v460_v49 = vpop.f32.mrb[0].mxu0 }
  0xed   : > { %v462_v50 = vpop.f32.mrb[1].mxu0  ;;  %v461_v52 = vadd.f32 %v460_v49, %v350_v51 }
  0xee   : > { %v463_v53 = vadd.f32 %v462_v50, %v350_v51 }
  0xf8   : > { %v575_v54 = vpop.f32.mrb[6].mxu1 }
  0xf9   : > { %v576_v55 = vadd.f32 %v575_v54, %v461_v52  ;;  %v577_v56 = vpop.f32.mrb[7].mxu1 }
  0xfa   : > { %v578_v57 = vadd.f32 %v577_v56, %v463_v53 }
  0xfc   : > { %v582_v58 = vpop.f32.mrb[0].mxu1 }
  0xfd   : > { %v584_v59 = vpop.f32.mrb[1].mxu1  ;;  %v2435_v9 = vadd.f32 %v582_v58, %v355_v0 }
  0xfe   : > { %v2437_v16 = vadd.f32 %v584_v59, %v355_v0 }
 0x100   : > { %v589_v60 = vpop.f32.mrb[2].mxu1 }
 0x101   : > { %v591_v61 = vpop.f32.mrb[3].mxu1  ;;  %v2439_v22 = vadd.f32 %v589_v60, %v360_v10 }
 0x102   : > { %v2441_v24 = vadd.f32 %v591_v61, %v360_v10 }
 0x104   : > { %v596_v62 = vpop.f32.mrb[4].mxu1 }
 0x105   : > { %v598_v63 = vpop.f32.mrb[5].mxu1  ;;  %v2443_v31 = vadd.f32 %v596_v62, %v365_v25 }
 0x106   : > { %v2445_v33 = vadd.f32 %v598_v63, %v365_v25 }
 0x120   : > { %v973_v1 = vpop.f32.mrb[2].mxu0 }
 0x121   : > { %v2431_v5 = vadd.f32 %v973_v1, %v576_v55  ;;  %v975_v6 = vpop.f32.mrb[3].mxu0 }
 0x122   : > { %v2434_v11 = vadd.f32 %v975_v6, %v578_v57 }
 0x123   : > { %v999_v12 = vmul.f32 0.5, %v2431_v5 }
 0x124   : > { %v1000_v17 = vmul.f32 0.5, %v2434_v11  ;;  %v980_v18 = vpop.f32.mrb[4].mxu0 }
 0x125   : > { %2530 = vtanh.f32 %v999_v12  ;;  %v2436_v19 = vadd.f32 %v2435_v9, %v980_v18  ;;  %v982_v20 = vpop.f32.mrb[5].mxu0 }
 0x126   : > { %2532 = vtanh.f32 %v1000_v17  ;;  %v2438_v21 = vadd.f32 %v2437_v16, %v982_v20 }
 0x127   : > { %v1001_v23 = vmul.f32 0.5, %v2436_v19 }
 0x128   : > { %v1002_v26 = vmul.f32 0.5, %v2438_v21  ;;  %v987_v27 = vpop.f32.mrb[6].mxu0 }
 0x129   : > { %2534 = vtanh.f32 %v1001_v23  ;;  %v2440_v28 = vadd.f32 %v2439_v22, %v987_v27  ;;  %v989_v29 = vpop.f32.mrb[7].mxu0 }
 0x12a   : > { %2536 = vtanh.f32 %v1002_v26  ;;  %v2442_v30 = vadd.f32 %v2441_v24, %v989_v29 }
 0x12b   : > { %v1003_v32 = vmul.f32 0.5, %v2440_v28 }
 0x12c   : > { %v1004_v34 = vmul.f32 0.5, %v2442_v30  ;;  %v994_v35 = vpop.f32.mrb[8].mxu0 }
 0x12d   : > { %2538 = vtanh.f32 %v1003_v32  ;;  %v2444_v36 = vadd.f32 %v2443_v31, %v994_v35  ;;  %v996_v37 = vpop.f32.mrb[9].mxu0 }
 0x12e   : > { %2540 = vtanh.f32 %v1004_v34  ;;  %v2446_v38 = vadd.f32 %v2445_v33, %v996_v37 }
 0x12f   : > { %v2531_v39 = vpop.eup %2530  ;;  %v1005_v40 = vmul.f32 0.5, %v2444_v36 }
 0x130   : > { %v2533_v41 = vpop.eup %2532  ;;  %v1015_v42 = vadd.f32 1.0, %v2531_v39  ;;  %v1006_v43 = vmul.f32 0.5, %v2446_v38 }
 0x131   : > { %v1016_v44 = vadd.f32 1.0, %v2533_v41  ;;  %2542 = vtanh.f32 %v1005_v40 }
 0x132   : > { %v1023_v45 = vmul.f32 0.5, %v1015_v42  ;;  %2544 = vtanh.f32 %v1006_v43 }
 0x133   : > { %v2535_v46 = vpop.eup %2534  ;;  %v1024_v47 = vmul.f32 0.5, %v1016_v44 }
 0x134   : > { %v2537_v49 = vpop.eup %2536  ;;  %v1031_v50 = vmul.f32 %v2431_v5, %v1023_v45  ;;  %v1017_v51 = vadd.f32 1.0, %v2535_v46  ;;  %v2574_v46 = vmov 1.0  }
 0x135   : > { %v1032_v52 = vmul.f32 %v2434_v11, %v1024_v47  ;;  %v1018_v53 = vadd.f32 1.0, %v2537_v49  ;;  %v1537_v47 = vld [vmem:[%s2827_s3 + $0x10] sm:$0xff]  ;;  %v1538_v49 = vld [vmem:[%s2827_s3 + $0x18] sm:$0xff] }
 0x136   : > { %v1025_v54 = vmul.f32 0.5, %v1017_v51  ;;  %v1554_v51 = vand.u32 4294901760, %v1538_v49 }
 0x137   : > { %v2539_v55 = vpop.eup %2538  ;;  %v1039_v56 = vadd.f32 %v1032_v52, %v1031_v50  ;;  %v1026_v57 = vmul.f32 0.5, %v1018_v53  ;;  %v1551_v50 = vand.u32 4294901760, %v1537_v47  ;;  %v1626_v52 = vand.u32 4294901760, %v2744_v14 }
 0x138   : > { %v2541_v58 = vpop.eup %2540  ;;  %v1033_v59 = vmul.f32 %v2436_v19, %v1025_v54  ;;  %v1019_v60 = vadd.f32 1.0, %v2539_v55  ;;  %v1633_v53 = vand.u32 4294901760, %v2746_v15 }
 0x139   : > { %v1063_v61 = vand.u32 4294901760, %v1039_v56  ;;  %v1034_v62 = vmul.f32 %v2438_v21, %v1026_v57  ;;  %v1020_v63 = vadd.f32 1.0, %v2541_v58  ;;  %v2395_v54 = vpack.c.bf16 %v1554_v51, %v1551_v50 }
 0x13a   : > { %v1027_v0 = vmul.f32 0.5, %v1019_v60  ;;  %v1639_v55 = vsub.f32 %v1537_v47, %v1551_v50  ;;  %v1627_v57 = vsub.f32 %v2744_v14, %v1626_v52  ;;  %v1634_v58 = vsub.f32 %v2746_v15, %v1633_v53 }
 0x13b   : > { %v2543_v1 = vpop.eup %2542  ;;  %v1138_v3 = vsub.f32 %v1039_v56, %v1063_v61  ;;  %v1040_v4 = vadd.f32 %v1034_v62, %v1033_v59  ;;  %v1028_v6 = vmul.f32 0.5, %v1020_v63  ;;  %v1646_v56 = vsub.f32 %v1538_v49, %v1554_v51  ;;  %2396 = vmatpush3.bf16.msra.mxu0 %v2395_v54 }
 0x13c   : > { %v2545_v7 = vpop.eup %2544  ;;  %v1035_v5 = vmul.f32 %v2440_v28, %v1027_v0  ;;  %v1021_v8 = vadd.f32 1.0, %v2543_v1  ;;  %v1628_v59 = vand.u32 4294901760, %v1627_v57  ;;  %v1640_v60 = vand.u32 4294901760, %v1639_v55  ;;  %2397 = vmatprep.subr.bf16.mxu0 %v2572_v48 }
 0x13d   : > { %v1139_v9 = vand.u32 4294901760, %v1138_v3  ;;  %v1066_v10 = vand.u32 4294901760, %v1040_v4  ;;  %v1036_v11 = vmul.f32 %v2442_v30, %v1028_v6  ;;  %v1022_v12 = vadd.f32 1.0, %v2545_v7 }
 0x13e   : > { %v1029_v16 = vmul.f32 0.5, %v1021_v8  ;;  %v1635_v62 = vand.u32 4294901760, %v1634_v58  ;;  %v1641_v63 = vsub.f32 %v1639_v55, %v1640_v60  ;;  %v2404_v7 = vpack.c.bf16 %v2746_v15, %v2744_v14  ;;  %v1539_v14 = vld [vmem:[%s2828_s4] sm:$0x1] }
 0x13f   : > { %v1145_v17 = vsub.f32 %v1040_v4, %v1066_v10  ;;  %v1041_v18 = vadd.f32 %v1036_v11, %v1035_v5  ;;  %v1030_v19 = vmul.f32 0.5, %v1022_v12  ;;  %v2356_v20 = vpack.c.bf16 %v1066_v10, %v1063_v61 }
 0x140   : > { %v1037_v22 = vmul.f32 %v2444_v36, %v1029_v16  ;;  %v1140_v21 = vsub.f32 %v1138_v3, %v1139_v9  ;;  %v1647_v61 = vand.u32 4294901760, %v1646_v56  ;;  %v2398_v1 = vpack.c.bf16 %v1635_v62, %v1628_v59 }
 0x141   : > { %v1146_v23 = vand.u32 4294901760, %v1145_v17  ;;  %v1069_v24 = vand.u32 4294901760, %v1041_v18  ;;  %v1038_v25 = vmul.f32 %v2446_v38, %v1030_v19  ;;  %2357 = vmatpush3.bf16.xpose.msra.mxu1 %v2356_v20  ;;  %v2368_v26 = vpack.c.bf16 %v1145_v17, %v1138_v3 }
 0x142   : > { %2358 = vmatprep.subr.bf16.mxu1 %v2572_v48  ;;  %v1141_v33 = vand.u32 4294901760, %v1140_v21  ;;  %v1648_v0 = vsub.f32 %v1646_v56, %v1647_v61  ;;  %v1642_v3 = vand.u32 4294901760, %v1641_v63  ;;  %v2407_v5 = vpack.c.bf16 %v1646_v56, %v1639_v55 }
 0x143   : > { %v1152_v27 = vsub.f32 %v1041_v18, %v1069_v24  ;;  %v1042_v28 = vadd.f32 %v1038_v25, %v1037_v22  ;;  %v1147_v29 = vsub.f32 %v1145_v17, %v1146_v23  ;;  %v2380_v31 = vpack.c.bf16 %v1146_v23, %v1139_v9 }
 0x144   : > { %v1649_v4 = vand.u32 4294901760, %v1648_v0  ;;  %v2416_v8 = vpack.c.bf16 %v1633_v53, %v1626_v52  ;;  %v2419_v9 = vpack.c.bf16 %v1647_v61, %v1640_v60 }
 0x145   : > { %v1153_v30 = vand.u32 4294901760, %v1152_v27  ;;  %v1072_v32 = vand.u32 4294901760, %v1042_v28  ;;  %v1148_v34 = vand.u32 4294901760, %v1147_v29 }
 0x146   : > { %v2401_v6 = vpack.c.bf16 %v1649_v4, %v1642_v3 }
 0x147   : > { %v1159_v35 = vsub.f32 %v1042_v28, %v1072_v32  ;;  %v2359_v37 = vpack.c.bf16 %v1072_v32, %v1069_v24  ;;  %v2362_v39 = vpack.c.bf16 %v1148_v34, %v1141_v33  ;;  %v1154_v40 = vsub.f32 %v1152_v27, %v1153_v30 }
 0x149   : > { %v1160_v36 = vand.u32 4294901760, %v1159_v35  ;;  %2360 = vmatpush3.bf16.xpose.msra.mxu1 %v2359_v37  ;;  %v2371_v41 = vpack.c.bf16 %v1159_v35, %v1152_v27  ;;  %v1155_v43 = vand.u32 4294901760, %v1154_v40 }
 0x14a   : > { %2361 = vmatprep.subr.bf16.mxu1 %v2572_v48 }
 0x14b   : > { %v1161_v38 = vsub.f32 %v1159_v35, %v1160_v36  ;;  %v2383_v42 = vpack.c.bf16 %v1160_v36, %v1153_v30 }
 0x14d   : > { %v1162_v44 = vand.u32 4294901760, %v1161_v38 }
 0x14f   : > { %v2365_v45 = vpack.c.bf16 %v1162_v44, %v1155_v43 }
 0x150   : > { %2232 = vmatmul.mubr.f32.vlgmr.msra.gmra.mrb[8].mxu1 %v2570_v2 }
 0x151   : > { %2363 = vmatpush3.bf16.xpose.msra.mxu1 %v2362_v39  ;;  %2242 = vmatprep.mubr.msk.f32.mxu1 %vm2573_vm2, %v2570_v2 }
 0x152   : > { %2364 = vmatprep.subr.bf16.mxu1 %v2572_v48 }
 0x159   : > { %2366 = vmatpush3.bf16.xpose.msra.mxu1 %v2365_v45 }
 0x15a   : > { %2367 = vmatprep.subr.bf16.mxu1 %v2572_v48 }
 0x160   : > { %2243 = vmatmul.mubr.f32.vlgmr.msra.gmra.mrb[8].mxu1 %v2574_v46 }
 0x161   : > { %2369 = vmatpush3.bf16.xpose.msra.mxu1 %v2368_v26  ;;  %2253 = vmatprep.mubr.msk.f32.mxu1 %vm2573_vm2, %v2570_v2 }
 0x162   : > { %2370 = vmatprep.subr.bf16.mxu1 %v2572_v48 }
 0x169   : > { %2372 = vmatpush3.bf16.xpose.msra.mxu1 %v2371_v41 }
 0x16a   : > { %2373 = vmatprep.subr.bf16.mxu1 %v2572_v48 }
 0x170   : > { %2254 = vmatmul.mubr.f32.vlgmr.msra.gmra.mrb[8].mxu1 %v2570_v2 }
 0x171   : > { %2375 = vmatpush3.bf16.xpose.msra.mxu1 %v2356_v20  ;;  %2264 = vmatprep.mubr.msk.f32.mxu1 %vm2573_vm2, %v2570_v2 }
 0x172   : > { %2376 = vmatprep.subr.bf16.mxu1 %v2572_v48 }
 0x179   : > { %2378 = vmatpush3.bf16.xpose.msra.mxu1 %v2359_v37 }
 0x17a   : > { %2379 = vmatprep.subr.bf16.mxu1 %v2572_v48 }
 0x180   : > { %2265 = vmatmul.mubr.f32.vlgmr.msra.gmra.mrb[8].mxu1 %v2570_v2 }
 0x181   : > { %2381 = vmatpush3.bf16.xpose.msra.mxu1 %v2380_v31  ;;  %2275 = vmatprep.mubr.msk.f32.mxu1 %vm2573_vm2, %v2570_v2 }
 0x182   : > { %2382 = vmatprep.subr.bf16.mxu1 %v2572_v48 }
 0x189   : > { %2384 = vmatpush3.bf16.xpose.msra.mxu1 %v2383_v42 }
 0x18a   : > { %2385 = vmatprep.subr.bf16.mxu1 %v2572_v48 }
 0x190   : > { %2276 = vmatmul.mubr.f32.vlgmr.msra.gmra.mrb[8].mxu1 %v2574_v46 }
 0x191   : > { %2387 = vmatpush3.bf16.xpose.msra.mxu1 %v2356_v20  ;;  %2286 = vmatprep.mubr.msk.f32.mxu1 %vm2573_vm2, %v2570_v2 }
 0x192   : > { %2388 = vmatprep.subr.bf16.mxu1 %v2572_v48 }
 0x199   : > { %2390 = vmatpush3.bf16.xpose.msra.mxu1 %v2359_v37 }
 0x1a0   : > { %2287 = vmatmul.mubr.f32.vlgmr.msra.gmra.mrb[8].mxu1 %v2574_v46 }
 0x273   : > { %v1530_v10 = vpop.f32.mrb[8].mxu1 }
 0x274   : > { %v1534_v11 = vmul.f32 0.00390625, %v1530_v10  ;;  %v2288_v12 = vpop.f32.mrb[9].mxu1 }
 0x276   : > { %v1542_v16 = vsel %vm1540_vm3, %v1534_v11, 0 }
 0x277   : > { %v1613_v17 = vand.u32 4294901760, %v1542_v16 }
 0x279   : > { %v1614_v18 = vsub.f32 %v1542_v16, %v1613_v17 }
 0x27b   : > { %v1615_v19 = vand.u32 4294901760, %v1614_v18 }
 0x27d   : > { %v1616_v20 = vsub.f32 %v1614_v18, %v1615_v19 }
 0x27f   : > { %v1617_v22 = vand.u32 4294901760, %v1616_v20 }
 0x281   : > { %2298 = vmatmul.mubr.f32.vlgmr.msra.gmra.mrb[10].mxu0 %v1617_v22 }
 0x282   : > { %2399 = vmatpush3.bf16.msra.mxu0 %v2398_v1  ;;  %2308 = vmatprep.mubr.msk.f32.mxu0 %vm2573_vm2, %v2570_v2 }
 0x283   : > { %2400 = vmatprep.subr.bf16.mxu0 %v2572_v48 }
 0x286   : > { %2402 = vmatpush3.bf16.msra.mxu0 %v2401_v6 }
 0x287   : > { %2403 = vmatprep.subr.bf16.mxu0 %v2572_v48 }
 0x289   : > { %2309 = vmatmul.mubr.f32.vlgmr.msra.gmra.mrb[10].mxu0 %v1613_v17 }
 0x28a   : > { %2405 = vmatpush3.bf16.msra.mxu0 %v2404_v7  ;;  %2319 = vmatprep.mubr.msk.f32.mxu0 %vm2573_vm2, %v2570_v2 }
 0x28b   : > { %2406 = vmatprep.subr.bf16.mxu0 %v2572_v48 }
 0x28e   : > { %2408 = vmatpush3.bf16.msra.mxu0 %v2407_v5 }
 0x28f   : > { %2409 = vmatprep.subr.bf16.mxu0 %v2572_v48 }
 0x291   : > { %2320 = vmatmul.mubr.f32.vlgmr.msra.gmra.mrb[10].mxu0 %v1614_v18 }
 0x292   : > { %2411 = vmatpush3.bf16.msra.mxu0 %v2742_v13  ;;  %2330 = vmatprep.mubr.msk.f32.mxu0 %vm2573_vm2, %v2570_v2 }
 0x293   : > { %2412 = vmatprep.subr.bf16.mxu0 %v2572_v48 }
 0x296   : > { %2414 = vmatpush3.bf16.msra.mxu0 %v2395_v54 }
 0x297   : > { %2415 = vmatprep.subr.bf16.mxu0 %v2572_v48 }
 0x299   : > { %2331 = vmatmul.mubr.f32.vlgmr.msra.gmra.mrb[10].mxu0 %v1615_v19 }
 0x29a   : > { %2417 = vmatpush3.bf16.msra.mxu0 %v2416_v8  ;;  %2341 = vmatprep.mubr.msk.f32.mxu0 %vm2573_vm2, %v2570_v2 }
 0x29b   : > { %2418 = vmatprep.subr.bf16.mxu0 %v2572_v48 }
 0x29e   : > { %2420 = vmatpush3.bf16.msra.mxu0 %v2419_v9 }
 0x29f   : > { %2421 = vmatprep.subr.bf16.mxu0 %v2572_v48 }
 0x2a1   : > { %2342 = vmatmul.mubr.f32.vlgmr.msra.gmra.mrb[10].mxu0 %v1613_v17 }
 0x2a2   : > { %2423 = vmatpush3.bf16.msra.mxu0 %v2742_v13  ;;  %2352 = vmatprep.mubr.msk.f32.mxu0 %vm2573_vm2, %v2570_v2 }
 0x2a3   : > { %2424 = vmatprep.subr.bf16.mxu0 %v2572_v48 }
 0x2a6   : > { %2426 = vmatpush3.bf16.msra.mxu0 %v2395_v54 }
 0x2a9   : > { %2353 = vmatmul.mubr.f32.vlgmr.msra.gmra.mrb[10].mxu0 %v1613_v17 }
 0x37c   : > { %v2025_v15 = vpop.f32.mrb[10].mxu0 }
 0x37d   : > { %v2447_v21 = vadd.f32 %v2025_v15, %v1539_v14  ;;  %v2354_v23 = vpop.f32.mrb[11].mxu0 }
 0x37f   : > { %2029 = vst [vmem:[%s329_s8] sm:$0x1] %v2447_v21 }
 0x380 PF: > { %s15_s20 = sadd.s32 1, %s2568_s20   ;;  %s2830_s18 = smov %s2564_s19 }
 0x381   : > { %p12_p5 = scmp.ge.s32.totalorder %s15_s20, 4   ;;  %s2831_s19 = smov %s2833_s21 }
 0x383   :  { %14 = sbr.rel (!%p12_p5) target bundleno = 2 (0x2), region = 87 }

</bundles_post_ra>
